<compile_context>
chip_gen: v7x
topology: tpu7x:2x2x1
jax: 0.10.0
libtpu: 0.0.40
codegen_flags: <defaults>
</compile_context>

<pallas_src>
import jax
import jax.numpy as jnp
from jax.experimental import pallas as pl
from jax.experimental.pallas import tpu as pltpu


def _copy_kernel(x_ref, o_ref):
    # Fully packed, lane-dense tile copy: pure vld/vst, no relayout.
    o_ref[...] = x_ref[...]


def _pick_tiling(total, itemsize,
                 max_block_bytes=4 << 20,
                 single_block_bytes=2 << 20):
    """Return (R, C, br, bc): a packed (R, C) view of `total` elements plus a
    (br, bc) block shape.

      * R * C == total
      * C is a multiple of 128 whenever total is (lane-dense, unmasked stores)
      * br is a multiple of 8 (or == R), bc is a multiple of 128 (or == C)
      * block bytes <= max_block_bytes, so 2x-in + 2x-out double buffers stay
        <= 16 MiB -- safe on v5e/v6e/v7x
      * tensors <= single_block_bytes use one full block (grid step overhead
        dominates there and there is no compute to overlap with)
    """
    total_bytes = total * itemsize

    if total % 128 == 0:
        # Lane-dense packed factorization: widest convenient C dividing total.
        C = 128
        for cand in (2048, 1024, 512, 256):
            if total % cand == 0:
                C = cand
                break
        R = total // C
        if total_bytes <= single_block_bytes or R <= 8:
            return R, C, R, C            # single full block, grid = (1, 1)
        # Row tiling: br multiple of 8, block <= max_block_bytes.
        br = (max_block_bytes // (C * itemsize)) // 8 * 8
        br = max(8, min(br, R // 8 * 8))
        return R, C, br, C

    # total not a multiple of 128: 1-row layout, tile the columns.
    R, C = 1, total
    if total_bytes <= single_block_bytes:
        return R, C, 1, C                # single full block, grid = (1, 1)
    bc = (max_block_bytes // itemsize) // 128 * 128
    bc = max(128, min(bc, C))
    return R, C, 1, bc                   # partial final block is masked by Pallas


def _pallas_flatten_copy(x2d):
    """Tiled Pallas copy of an already-flattened (N, flat) array."""
    N, flat = x2d.shape
    total = N * flat
    itemsize = x2d.dtype.itemsize

    R, C, br, bc = _pick_tiling(total, itemsize)

    # Free, metadata-only re-view of the contiguous buffer into packed tiles.
    x_packed = x2d.reshape(R, C)
    grid = (pl.cdiv(R, br), pl.cdiv(C, bc))

    y_packed = pl.pallas_call(
        _copy_kernel,
        out_shape=jax.ShapeDtypeStruct((R, C), x2d.dtype),
        grid=grid,
        in_specs=[pl.BlockSpec((br, bc), lambda i, j: (i, j))],
        out_specs=pl.BlockSpec((br, bc), lambda i, j: (i, j)),
        compiler_params=pltpu.CompilerParams(
            # "parallel": lets v7x shard the DMA-bound copy across its 2 TCs
            # when there are >= 2 grid steps; harmless (1 TC) on v5e/v6e.
            dimension_semantics=("parallel", "parallel"),
            # Explicit scoped-VMEM limit (v5e default is only 16 MiB); the
            # <= 4 MiB blocks above keep the 4-buffer footprint <= 16 MiB.
            vmem_limit_bytes=32 << 20,
        ),
        cost_estimate=pl.CostEstimate(
            flops=0, transcendentals=0, bytes_accessed=2 * total * itemsize),
    )(x_packed)

    # Free re-view back to the logical flattened shape.
    return y_packed.reshape(N, flat)


def lambda_module_forward(x, use_pallas_copy=False):
    """Pallas/JAX implementation of LambdaModule(lambda x: x.view(x.size(0), -1)).

    Default path returns the metadata-only reshape (exactly torch .view of a
    contiguous row-major tensor) -- no kernel, no HBM traffic.  Set
    `use_pallas_copy=True` to run the tiled Pallas copy instead (only useful
    when the flatten is to be fused with surrounding in-kernel work).
    """
    N = x.shape[0]
    flat = 1
    for d in x.shape[1:]:
        flat *= d
    x2d = x.reshape(N, flat)
    if not use_pallas_copy:
        return x2d
    return _pallas_flatten_copy(x2d)


if __name__ == "__main__":
    key = jax.random.PRNGKey(0)
    # Small NCHW activation feeding a flatten, as in FedAVG model defs.
    N, C, H, W = 2, 4, 16, 16
    x = jax.random.normal(key, (N, C, H, W), dtype=jnp.float32)

    # Reference: torch .view(N, -1) == row-major reshape of contiguous NCHW.
    y_ref = x.reshape(N, -1)

    # Default (recommended) path: free, metadata-only reshape.
    y_fast = jax.block_until_ready(lambda_module_forward(x))
    assert y_fast.shape == (N, C * H * W)
    assert jnp.array_equal(y_fast, y_ref), "reshape path mismatch vs reference"

    # Pallas path (for the fused-with-surrounding-work use case).
    y_pl = jax.block_until_ready(lambda_module_forward(x, use_pallas_copy=True))
    assert y_pl.shape == (N, C * H * W)
    assert jnp.array_equal(y_pl, y_ref), "Pallas flatten mismatch vs reference"

    print("KERNEL_OK")
</pallas_src>

<mosaic_0001>
module attributes {stable_mosaic.version = 11 : i64} {
  func.func @_copy_kernel(%arg0: i32, %arg1: i32, %arg2: memref<1x2048xf32, #tpu.memory_space<vmem>>, %arg3: memref<1x2048xf32, #tpu.memory_space<vmem>>) attributes {dimension_semantics = [#tpu.dimension_semantics<parallel>, #tpu.dimension_semantics<parallel>], iteration_bounds = array<i64: 1, 1>, scalar_prefetch = 0 : i64, scratch_operands = 0 : i64, tpu.core_type = #tpu.core_type<tc>, window_params = [{transform_indices = @transform_0, window_bounds = array<i64: 1, 2048>}, {transform_indices = @transform_1, window_bounds = array<i64: 1, 2048>}]} {
    %c0 = arith.constant 0 : index
    %c0_0 = arith.constant 0 : index
    %0 = vector.load %arg2[%c0, %c0_0] : memref<1x2048xf32, #tpu.memory_space<vmem>>, vector<1x2048xf32>
    %c0_1 = arith.constant 0 : index
    %c0_2 = arith.constant 0 : index
    %1 = vector.load %arg3[%c0_1, %c0_2] : memref<1x2048xf32, #tpu.memory_space<vmem>>, vector<1x2048xf32>
    tpu.vector_store %arg3[%c0_1, %c0_2], %0 {strides = array<i32>} : memref<1x2048xf32, #tpu.memory_space<vmem>>, vector<1x2048xf32>,
    return
  }
  func.func @transform_0(%arg0: i32, %arg1: i32) -> (i32, i32) {
    %c0_i32 = arith.constant 0 : i32
    return %arg0, %arg1 : i32, i32
  }
  func.func @transform_1(%arg0: i32, %arg1: i32) -> (i32, i32) {
    %c0_i32 = arith.constant 0 : i32
    return %arg0, %arg1 : i32, i32
  }
}

</mosaic_0001>

<bundles_post_ra>
// kernel: tpu_custom_call.1
= control target key start
LH: loop header
LB: loop body
LE: loop exit
PB: predicated region body
PF: predicated region fallthrough
CT: control target
= control target key end

     0   :  { %6 = vsyncpa [#allocation3], 0  ;;  %s126_s0 = inlined_call_operand.hbm [shape: f32[1,2048], index: 0, kind: input, shape index: {}]   ;;  %s127_s1 = inlined_call_operand.hbm [shape: f32[1,2048], index: 1, kind: output, shape index: {}]  }
   0x1   :  { %7 = vsyncpa [#allocation4], 0  ;;  %s90_s6 = smov [#allocation2]   ;;  %s42_s10 = scalar_lea.hbm %s126_s0, 256 }
   0x2   :  { %s14_s7 = sshll.u32 %s90_s6, 4  ;;  %p43_p0 = scmp.ne.s32.totalorder %s126_s0, %s42_s10  ;;  %s15_s7 = int_to_ptr.vmem [resolvable:$true] %s14_s7 }
   0x3   :  { %p46_p1 = scmp.lt.u32.totalorder %s42_s10, %s126_s0 }
   0x5   :  { %p48_p2 = pnand %p46_p1, %p43_p0 }
   0x7   :  { %51 = shalt.err (!%p48_p2)
}
   0x8   :  { %s52_s15 = scalar_lea.vmem %s15_s7, 256  ;;  %p57_p4 = scmp.lt.s32.totalorder %s15_s7, %s15_s7 }
   0x9   :  { %p53_p3 = scmp.ne.s32.totalorder %s15_s7, %s52_s15  ;;  %p58_p5 = scmp.lt.s32.totalorder %s52_s15, %s52_s15 }
   0xb   :  { %p59_p6 = por %p58_p5, %p57_p4 }
   0xd   :  { %p60_p7 = pnand %p59_p6, %p53_p3 }
   0xf   :  { %63 = shalt.err (!%p60_p7)
}
  0x10   :  { %17 = dma.hbm_to_vmem [thread:$0]  %s126_s0, 256, %s15_s7, [#allocation3]  }
  0x11   :  { %86 = dma.done.wait [#allocation3], 256  }
  0x12   :  { %87 = vsyncadd [#allocation3], 4294967040  ;;  %s91_s18 = smov [#allocation5]   ;;  %v21_v0 = vld [vmem:[#allocation2] sm:$0xff]  ;;  %v22_v1 = vld [vmem:[#allocation2 + $0x8] sm:$0xff] }
  0x13   :  { %s31_s19 = sshll.u32 %s91_s18, 4  ;;  %23 = vst [vmem:[#allocation5] sm:$0xff] %v21_v0  ;;  %24 = vst [vmem:[#allocation5 + $0x8] sm:$0xff] %v22_v1  ;;  %s32_s19 = int_to_ptr.vmem [resolvable:$true] %s31_s19 }
  0x14   :  { %s64_s20 = scalar_lea.vmem %s32_s19, 256  ;;  %p69_p9 = scmp.lt.s32.totalorder %s32_s19, %s32_s19 }
  0x15   :  { %p65_p8 = scmp.ne.s32.totalorder %s32_s19, %s64_s20  ;;  %p70_p10 = scmp.lt.s32.totalorder %s64_s20, %s64_s20 }
  0x17   :  { %p71_p11 = por %p70_p10, %p69_p9 }
  0x19   :  { %p72_p12 = pnand %p71_p11, %p65_p8 }
  0x1b   :  { %75 = shalt.err (!%p72_p12)
}
  0x1c   :  { %s76_s0 = scalar_lea.hbm %s127_s1, 256 }
  0x1d   :  { %p77_p13 = scmp.ne.s32.totalorder %s127_s1, %s76_s0  ;;  %p80_p0 = scmp.lt.u32.totalorder %s76_s0, %s127_s1 }
  0x1f   :  { %p82_p1 = pnand %p80_p0, %p77_p13 }
  0x21   :  { %85 = shalt.err (!%p82_p1)
}
  0x22   :  { %34 = dma.vmem_to_hbm [thread:$0]  %s32_s19, 256, %s127_s1, [#allocation4]  }
  0x23   :  { %88 = dma.done.wait [#allocation4], 256  }
  0x24   :  { %89 = vsyncadd [#allocation4], 4294967040 }
  0x25   :  { %38 = vsyncpa [#allocation3], 1 }
  0x26   :  { %39 = vsyncpa [#allocation4], 1 }

</bundles_post_ra>
